<compile_context>
chip_gen: v6e
topology: v6e:2x2x1
jax: 0.10.0
libtpu: 0.0.40
codegen_flags: <defaults>
</compile_context>

<pallas_src>
import jax
import jax.numpy as jnp
from jax import lax
from jax.experimental import pallas as pl

# ----------------------------- config ---------------------------------------
B = 2              # batch
S = 8              # sequence length
HIDDEN = 32        # hidden size
NUM_HEADS = 4
NUM_KV_HEADS = 2
HEAD_DIM = HIDDEN // NUM_HEADS          # 8
Q_SIZE = NUM_HEADS * HEAD_DIM           # 32
KV_SIZE = NUM_KV_HEADS * HEAD_DIM       # 16
QK_SIZE = Q_SIZE + KV_SIZE              # 48
QKV_SIZE = Q_SIZE + 2 * KV_SIZE         # 64
SCALE = HEAD_DIM ** -0.5
ROPE_THETA = 10000.0
RMS_EPS = 1e-6
GROUP = NUM_HEADS // NUM_KV_HEADS       # query heads per kv head

# dot_general dims for x[M,K] @ w[N,K]^T -> [M,N]  (no transpose anywhere)
_NT_DIMS = (((1,), (1,)), ((), ()))


# ----------------------- fused attention kernel ------------------------------
def _fused_attn_kernel(x_ref, wqkv_ref, wo_ref, cs_ref, mats_ref, o_ref):
    # x_ref   : (B*S, HIDDEN)
    # wqkv_ref: (QKV_SIZE, HIDDEN)   PyTorch (out, in) layout
    # wo_ref  : (HIDDEN, Q_SIZE)     PyTorch (out, in) layout
    # cs_ref  : (2, B*S, QK_SIZE)    [0]=cos*(norm_w*scale), [1]=sin*scale
    # mats_ref: (2, QK_SIZE, QK_SIZE)[0]=block-avg matrix, [1]=rotate-half*norm_w
    # o_ref   : (B*S, HIDDEN)
    x = x_ref[...]                                                    # (BS, H)

    # ---- qkv projection for the whole batch in one NT matmul ----
    qkv = lax.dot_general(x, wqkv_ref[...], _NT_DIMS,
                          preferred_element_type=jnp.float32)         # (BS, 64)

    qk = qkv[:, :QK_SIZE]                                             # (BS, 48)
    v = qkv[:, QK_SIZE:]                                              # (BS, 16)

    # ---- full-width per-head RMSNorm: variance via block-averaging matmul ----
    var_e = jnp.dot(qk * qk, mats_ref[0],
                    preferred_element_type=jnp.float32)               # (BS, 48)
    qk_rsn = qk * lax.rsqrt(var_e + RMS_EPS)

    # ---- full-width RoPE: rotate-half via block-diagonal rotation matmul ----
    # norm weights and the attention SCALE are folded into cs/mats host-side.
    qk_rot = jnp.dot(qk_rsn, mats_ref[1],
                     preferred_element_type=jnp.float32)              # (BS, 48)
    qk_rope = qk_rsn * cs_ref[0] + qk_rot * cs_ref[1]

    q = qk_rope[:, :Q_SIZE]                                           # (BS, 32)
    k = qk_rope[:, Q_SIZE:]                                           # (BS, 16)

    # causal mask for GROUP-stacked query rows: row r is query position r % S
    qpos = lax.broadcasted_iota(jnp.int32, (GROUP * S, S), 0) % S
    kpos = lax.broadcasted_iota(jnp.int32, (GROUP * S, S), 1)
    causal_g = kpos <= qpos

    # ---- GQA attention: one matmul pair per (batch, kv-head) ----
    batch_outs = []
    for b in range(B):
        r0 = b * S
        head_outs = [None] * NUM_HEADS
        for kvh in range(NUM_KV_HEADS):
            h0 = kvh * GROUP
            qg = jnp.concatenate(
                [q[r0:r0 + S, (h0 + g) * HEAD_DIM:(h0 + g + 1) * HEAD_DIM]
                 for g in range(GROUP)], axis=0)                      # (G*S, D)
            kb = k[r0:r0 + S, kvh * HEAD_DIM:(kvh + 1) * HEAD_DIM]    # (S, D)
            vb = v[r0:r0 + S, kvh * HEAD_DIM:(kvh + 1) * HEAD_DIM]    # (S, D)

            scores = lax.dot_general(qg, kb, _NT_DIMS,
                                     preferred_element_type=jnp.float32)
            scores = jnp.where(causal_g, scores, -1e30)
            m = jnp.max(scores, axis=-1, keepdims=True)
            e = jnp.exp(scores - m)
            p = e / jnp.sum(e, axis=-1, keepdims=True)                # exact recip
            og = jnp.dot(p, vb, preferred_element_type=jnp.float32)   # (G*S, D)
            for g in range(GROUP):
                head_outs[h0 + g] = og[g * S:(g + 1) * S, :]
        batch_outs.append(jnp.concatenate(head_outs, axis=-1))        # (S, 32)
    attn = jnp.concatenate(batch_outs, axis=0)                        # (BS, 32)

    # ---- output projection for the whole batch in one NT matmul ----
    out = lax.dot_general(attn, wo_ref[...], _NT_DIMS,
                          preferred_element_type=jnp.float32)         # (BS, H)
    o_ref[...] = out.astype(o_ref.dtype)


# ----------------------------- host-side tables -------------------------------
def rope_tables(positions, head_dim, theta):
    # neox-style: inv_freq over even dims, cos/sin = cat(freqs, freqs)
    inv_freq = 1.0 / (theta ** (jnp.arange(0, head_dim, 2, dtype=jnp.float32)
                                / head_dim))
    freqs = positions.astype(jnp.float32)[:, None] * inv_freq[None, :]
    emb = jnp.concatenate([freqs, freqs], axis=-1)                    # (S, D)
    return jnp.cos(emb), jnp.sin(emb)


def _build_tables(positions, batch, q_norm_w, k_norm_w):
    """cos/sin tables (norm weight + SCALE folded) and the constant matrices."""
    cos, sin = rope_tables(positions, HEAD_DIM, ROPE_THETA)           # (S, D)
    n_qk = NUM_HEADS + NUM_KV_HEADS
    cos_full = jnp.tile(cos, (batch, n_qk))                           # (B*S, 48)
    sin_full = jnp.tile(sin, (batch, n_qk))

    w_full = jnp.concatenate([jnp.tile(q_norm_w, NUM_HEADS),
                              jnp.tile(k_norm_w, NUM_KV_HEADS)])      # (48,)
    scale_cols = jnp.concatenate(
        [jnp.full((Q_SIZE,), SCALE, jnp.float32),
         jnp.ones((KV_SIZE,), jnp.float32)])                          # (48,)

    cos_fold = cos_full * (w_full * scale_cols)[None, :]
    sin_fold = sin_full * scale_cols[None, :]

    # per-head block-diagonal constants
    half = HEAD_DIM // 2
    idx = jnp.arange(half)
    r_d = jnp.zeros((HEAD_DIM, HEAD_DIM), jnp.float32)
    r_d = r_d.at[idx + half, idx].set(-1.0)   # out col j<half  <- -t[j+half]
    r_d = r_d.at[idx, idx + half].set(1.0)    # out col j>=half <-  t[j-half]
    eye_h = jnp.eye(n_qk, dtype=jnp.float32)
    m_avg = jnp.kron(eye_h,
                     jnp.full((HEAD_DIM, HEAD_DIM), 1.0 / HEAD_DIM, jnp.float32))
    r_w = w_full[:, None] * jnp.kron(eye_h, r_d)   # fold norm weight into rows

    cs = jnp.stack([cos_fold, sin_fold], axis=0)       # (2, B*S, 48)
    mats = jnp.stack([m_avg, r_w], axis=0)             # (2, 48, 48)
    return cs, mats


@jax.jit
def llama_attention_forward(positions, hidden_states, w_qkv, w_o,
                            q_norm_w, k_norm_w):
    """positions: [S] int32; hidden_states: [B, S, HIDDEN] f32.
    w_qkv: [(H+2*KVH)*D, HIDDEN]; w_o: [HIDDEN, H*D] (PyTorch (out, in))."""
    Bh, Sh, Hm = hidden_states.shape
    x2d = hidden_states.reshape(Bh * Sh, Hm)
    cs, mats = _build_tables(positions, Bh, q_norm_w, k_norm_w)

    # Single-invocation pallas_call: every operand fits VMEM whole, so no grid,
    # no BlockSpec windows, no per-step pipeline overhead.
    # NOTE: at real Llama shapes, reintroduce a batch/head 'parallel' grid axis
    # (v7x 2-TC), tile the KV axis flash-style ('arbitrary'), single-buffer the
    # weights (pl.Buffered(1)) and set pltpu.CompilerParams(vmem_limit_bytes=...).
    out2d = pl.pallas_call(
        _fused_attn_kernel,
        out_shape=jax.ShapeDtypeStruct((Bh * Sh, Hm), hidden_states.dtype),
    )(x2d, w_qkv, w_o, cs, mats)
    return out2d.reshape(Bh, Sh, Hm)


# ----------------------------- pure-JAX reference -----------------------------
def reference_forward(positions, hidden_states, w_qkv, w_o, q_norm_w, k_norm_w):
    Bh, Sh, Hm = hidden_states.shape
    x2d = hidden_states.reshape(Bh * Sh, Hm)
    qkv = x2d @ w_qkv.T
    q = qkv[:, :Q_SIZE].reshape(Bh, Sh, NUM_HEADS, HEAD_DIM).transpose(0, 2, 1, 3)
    k = qkv[:, Q_SIZE:Q_SIZE + KV_SIZE].reshape(
        Bh, Sh, NUM_KV_HEADS, HEAD_DIM).transpose(0, 2, 1, 3)
    v = qkv[:, Q_SIZE + KV_SIZE:].reshape(
        Bh, Sh, NUM_KV_HEADS, HEAD_DIM).transpose(0, 2, 1, 3)

    def rms(x, w):
        var = jnp.mean(x.astype(jnp.float32) ** 2, axis=-1, keepdims=True)
        return (x * lax.rsqrt(var + RMS_EPS)) * w

    q = rms(q, q_norm_w)
    k = rms(k, k_norm_w)

    cos, sin = rope_tables(positions, HEAD_DIM, ROPE_THETA)

    def rope(x):
        half = HEAD_DIM // 2
        x1, x2 = x[..., :half], x[..., half:]
        rot = jnp.concatenate([-x2, x1], axis=-1)
        return x * cos + rot * sin

    q = rope(q)
    k = rope(k)

    k_rep = jnp.repeat(k, GROUP, axis=1)
    v_rep = jnp.repeat(v, GROUP, axis=1)
    s = jnp.einsum("bhqd,bhkd->bhqk", q, k_rep) * SCALE
    mask = jnp.tril(jnp.ones((Sh, Sh), dtype=bool))
    s = jnp.where(mask, s, -1e30)
    p = jax.nn.softmax(s, axis=-1)
    attn = jnp.einsum("bhqk,bhkd->bhqd", p, v_rep)
    attn2d = attn.transpose(0, 2, 1, 3).reshape(Bh * Sh, NUM_HEADS * HEAD_DIM)
    return (attn2d @ w_o.T).reshape(Bh, Sh, HIDDEN)


# ----------------------------- main ------------------------------------------
if __name__ == "__main__":
    key = jax.random.PRNGKey(0)
    k1, k2, k3, k4, k5 = jax.random.split(key, 5)

    hidden_states = jax.random.normal(k1, (B, S, HIDDEN), dtype=jnp.float32)
    positions = jnp.arange(S, dtype=jnp.int32)

    # parameters (deterministic, module-shaped; PyTorch (out, in) layout)
    w_qkv = 0.05 * jax.random.normal(k2, (QKV_SIZE, HIDDEN), jnp.float32)
    w_o = 0.05 * jax.random.normal(k3, (HIDDEN, Q_SIZE), jnp.float32)
    # RMSNorm weights (perturbed from ones so the qk-norm path is exercised)
    q_norm_w = 1.0 + 0.1 * jax.random.normal(k4, (HEAD_DIM,), jnp.float32)
    k_norm_w = 1.0 + 0.1 * jax.random.normal(k5, (HEAD_DIM,), jnp.float32)

    out = llama_attention_forward(positions, hidden_states, w_qkv, w_o,
                                  q_norm_w, k_norm_w)
    out = jax.block_until_ready(out)

    ref = reference_forward(positions, hidden_states, w_qkv, w_o,
                            q_norm_w, k_norm_w)
    assert out.shape == (B, S, HIDDEN)
    # tolerance covers default-precision MXU/XLA matmul rounding differences
    assert jnp.allclose(out, ref, atol=2e-3, rtol=2e-3), (
        float(jnp.max(jnp.abs(out - ref))))

    print("KERNEL_OK")
</pallas_src>

<mosaic_0001>
module attributes {stable_mosaic.version = 11 : i64} {
  func.func @_fused_attn_kernel(%arg0: memref<16x32xf32, #tpu.memory_space<vmem>>, %arg1: memref<64x32xf32, #tpu.memory_space<vmem>>, %arg2: memref<32x32xf32, #tpu.memory_space<vmem>>, %arg3: memref<2x16x48xf32, #tpu.memory_space<vmem>>, %arg4: memref<2x48x48xf32, #tpu.memory_space<vmem>>, %arg5: memref<16x32xf32, #tpu.memory_space<vmem>>) attributes {dimension_semantics = [], scalar_prefetch = 0 : i64, scratch_operands = 0 : i64, tpu.core_type = #tpu.core_type<tc>} {
    %c0 = arith.constant 0 : index
    %c0_0 = arith.constant 0 : index
    %0 = vector.load %arg0[%c0, %c0_0] : memref<16x32xf32, #tpu.memory_space<vmem>>, vector<16x32xf32>
    %c0_1 = arith.constant 0 : index
    %c0_2 = arith.constant 0 : index
    %1 = vector.load %arg1[%c0_1, %c0_2] : memref<64x32xf32, #tpu.memory_space<vmem>>, vector<64x32xf32>
    %cst = arith.constant dense<0.000000e+00> : vector<16x64xf32>
    %2 = tpu.matmul %0, %1, %cst {dimension_numbers = #tpu.dot_dimension_numbers<[1], [1], [0], [0], [0, 0, 1, 0], [], []>} : vector<16x32xf32>, vector<64x32xf32>, vector<16x64xf32> -> vector<16x64xf32>
    %3 = vector.extract_strided_slice %2 {offsets = [0, 0], sizes = [16, 48], strides = [1, 1]} : vector<16x64xf32> to vector<16x48xf32>
    %4 = vector.extract_strided_slice %2 {offsets = [0, 48], sizes = [16, 16], strides = [1, 1]} : vector<16x64xf32> to vector<16x16xf32>
    %5 = arith.mulf %3, %3 : vector<16x48xf32>
    %c0_3 = arith.constant 0 : index
    %c0_4 = arith.constant 0 : index
    %c0_5 = arith.constant 0 : index
    %6 = vector.load %arg4[%c0_3, %c0_4, %c0_5] : memref<2x48x48xf32, #tpu.memory_space<vmem>>, vector<1x48x48xf32>
    %7 = vector.shape_cast %6 : vector<1x48x48xf32> to vector<48x48xf32>
    %cst_6 = arith.constant dense<0.000000e+00> : vector<16x48xf32>
    %8 = tpu.matmul %5, %7, %cst_6 {dimension_numbers = #tpu.dot_dimension_numbers<[1], [0], [0], [1], [0, 0, 1, 1], [], []>} : vector<16x48xf32>, vector<48x48xf32>, vector<16x48xf32> -> vector<16x48xf32>
    %cst_7 = arith.constant 9.99999997E-7 : f32
    %9 = vector.broadcast %cst_7 : f32 to vector<16x48xf32>
    %10 = arith.addf %8, %9 : vector<16x48xf32>
    %11 = math.rsqrt %10 : vector<16x48xf32>
    %12 = arith.mulf %3, %11 : vector<16x48xf32>
    %c1 = arith.constant 1 : index
    %c0_8 = arith.constant 0 : index
    %c0_9 = arith.constant 0 : index
    %13 = vector.load %arg4[%c1, %c0_8, %c0_9] : memref<2x48x48xf32, #tpu.memory_space<vmem>>, vector<1x48x48xf32>
    %14 = vector.shape_cast %13 : vector<1x48x48xf32> to vector<48x48xf32>
    %cst_10 = arith.constant dense<0.000000e+00> : vector<16x48xf32>
    %15 = tpu.matmul %12, %14, %cst_10 {dimension_numbers = #tpu.dot_dimension_numbers<[1], [0], [0], [1], [0, 0, 1, 1], [], []>} : vector<16x48xf32>, vector<48x48xf32>, vector<16x48xf32> -> vector<16x48xf32>
    %c0_11 = arith.constant 0 : index
    %c0_12 = arith.constant 0 : index
    %c0_13 = arith.constant 0 : index
    %16 = vector.load %arg3[%c0_11, %c0_12, %c0_13] : memref<2x16x48xf32, #tpu.memory_space<vmem>>, vector<1x16x48xf32>
    %17 = vector.shape_cast %16 : vector<1x16x48xf32> to vector<16x48xf32>
    %18 = arith.mulf %12, %17 : vector<16x48xf32>
    %c1_14 = arith.constant 1 : index
    %c0_15 = arith.constant 0 : index
    %c0_16 = arith.constant 0 : index
    %19 = vector.load %arg3[%c1_14, %c0_15, %c0_16] : memref<2x16x48xf32, #tpu.memory_space<vmem>>, vector<1x16x48xf32>
    %20 = vector.shape_cast %19 : vector<1x16x48xf32> to vector<16x48xf32>
    %21 = arith.mulf %15, %20 : vector<16x48xf32>
    %22 = arith.addf %18, %21 : vector<16x48xf32>
    %23 = vector.extract_strided_slice %22 {offsets = [0, 0], sizes = [16, 32], strides = [1, 1]} : vector<16x48xf32> to vector<16x32xf32>
    %24 = vector.extract_strided_slice %22 {offsets = [0, 32], sizes = [16, 16], strides = [1, 1]} : vector<16x48xf32> to vector<16x16xf32>
    %25 = tpu.iota {dimensions = array<i32: 0>} : vector<16x8xi32>
    %c8_i32 = arith.constant 8 : i32
    %c0_i32 = arith.constant 0 : i32
    %26 = arith.cmpi eq, %c8_i32, %c0_i32 : i32
    %c1_i32 = arith.constant 1 : i32
    %27 = arith.select %26, %c1_i32, %c8_i32 : i32
    %28 = vector.broadcast %27 : i32 to vector<16x8xi32>
    %29 = arith.remsi %25, %28 : vector<16x8xi32>
    %c0_i32_17 = arith.constant 0 : i32
    %30 = vector.broadcast %c0_i32_17 : i32 to vector<16x8xi32>
    %31 = arith.cmpi ne, %29, %30 : vector<16x8xi32>
    %c0_i32_18 = arith.constant 0 : i32
    %32 = vector.broadcast %c0_i32_18 : i32 to vector<16x8xi32>
    %33 = arith.cmpi slt, %29, %32 : vector<16x8xi32>
    %c0_i32_19 = arith.constant 0 : i32
    %34 = arith.cmpi slt, %27, %c0_i32_19 : i32
    %35 = vector.broadcast %34 : i1 to vector<16x8xi1>
    %36 = vector.broadcast %35 : vector<16x8xi1> to vector<16x8xi1>
    %37 = arith.xori %33, %36 : vector<16x8xi1>
    %38 = arith.andi %37, %31 : vector<16x8xi1>
    %39 = vector.broadcast %27 : i32 to vector<16x8xi32>
    %40 = arith.addi %29, %39 : vector<16x8xi32>
    %41 = arith.select %38, %40, %29 : vector<16x8xi1>, vector<16x8xi32>
    %42 = tpu.iota {dimensions = array<i32: 1>} : vector<16x8xi32>
    %43 = arith.cmpi sle, %42, %41 : vector<16x8xi32>
    %44 = vector.extract_strided_slice %23 {offsets = [0, 0], sizes = [8, 8], strides = [1, 1]} : vector<16x32xf32> to vector<8x8xf32>
    %45 = vector.extract_strided_slice %23 {offsets = [0, 8], sizes = [8, 8], strides = [1, 1]} : vector<16x32xf32> to vector<8x8xf32>
    %46 = tpu.concatenate %44, %45 in 0 : vector<8x8xf32>, vector<8x8xf32> -> vector<16x8xf32>
    %47 = vector.extract_strided_slice %24 {offsets = [0, 0], sizes = [8, 8], strides = [1, 1]} : vector<16x16xf32> to vector<8x8xf32>
    %48 = vector.extract_strided_slice %4 {offsets = [0, 0], sizes = [8, 8], strides = [1, 1]} : vector<16x16xf32> to vector<8x8xf32>
    %cst_20 = arith.constant dense<0.000000e+00> : vector<16x8xf32>
    %49 = tpu.matmul %46, %47, %cst_20 {dimension_numbers = #tpu.dot_dimension_numbers<[1], [1], [0], [0], [0, 0, 1, 0], [], []>} : vector<16x8xf32>, vector<8x8xf32>, vector<16x8xf32> -> vector<16x8xf32>
    %cst_21 = arith.constant -1.000000e+30 : f32
    %50 = vector.broadcast %cst_21 : f32 to vector<16x8xf32>
    %51 = arith.select %43, %49, %50 : vector<16x8xi1>, vector<16x8xf32>
    %cst_22 = arith.constant dense<0xFF800000> : vector<16xf32>
    %52 = vector.multi_reduction <maximumf>, %51, %cst_22 [1] : vector<16x8xf32> to vector<16xf32>
    %53 = vector.shape_cast %52 : vector<16xf32> to vector<16x1xf32>
    %54 = vector.broadcast %53 : vector<16x1xf32> to vector<16x8xf32>
    %55 = arith.subf %51, %54 : vector<16x8xf32>
    %56 = math.exp %55 : vector<16x8xf32>
    %cst_23 = arith.constant dense<0.000000e+00> : vector<16xf32>
    %57 = vector.multi_reduction <add>, %56, %cst_23 [1] : vector<16x8xf32> to vector<16xf32>
    %58 = vector.shape_cast %57 : vector<16xf32> to vector<16x1xf32>
    %59 = vector.broadcast %58 : vector<16x1xf32> to vector<16x8xf32>
    %60 = arith.divf %56, %59 : vector<16x8xf32>
    %cst_24 = arith.constant dense<0.000000e+00> : vector<16x8xf32>
    %61 = tpu.matmul %60, %48, %cst_24 {dimension_numbers = #tpu.dot_dimension_numbers<[1], [0], [0], [1], [0, 0, 1, 1], [], []>} : vector<16x8xf32>, vector<8x8xf32>, vector<16x8xf32> -> vector<16x8xf32>
    %62 = vector.extract_strided_slice %61 {offsets = [0, 0], sizes = [8, 8], strides = [1, 1]} : vector<16x8xf32> to vector<8x8xf32>
    %63 = vector.extract_strided_slice %61 {offsets = [8, 0], sizes = [8, 8], strides = [1, 1]} : vector<16x8xf32> to vector<8x8xf32>
    %64 = vector.extract_strided_slice %23 {offsets = [0, 16], sizes = [8, 8], strides = [1, 1]} : vector<16x32xf32> to vector<8x8xf32>
    %65 = vector.extract_strided_slice %23 {offsets = [0, 24], sizes = [8, 8], strides = [1, 1]} : vector<16x32xf32> to vector<8x8xf32>
    %66 = tpu.concatenate %64, %65 in 0 : vector<8x8xf32>, vector<8x8xf32> -> vector<16x8xf32>
    %67 = vector.extract_strided_slice %24 {offsets = [0, 8], sizes = [8, 8], strides = [1, 1]} : vector<16x16xf32> to vector<8x8xf32>
    %68 = vector.extract_strided_slice %4 {offsets = [0, 8], sizes = [8, 8], strides = [1, 1]} : vector<16x16xf32> to vector<8x8xf32>
    %cst_25 = arith.constant dense<0.000000e+00> : vector<16x8xf32>
    %69 = tpu.matmul %66, %67, %cst_25 {dimension_numbers = #tpu.dot_dimension_numbers<[1], [1], [0], [0], [0, 0, 1, 0], [], []>} : vector<16x8xf32>, vector<8x8xf32>, vector<16x8xf32> -> vector<16x8xf32>
    %cst_26 = arith.constant -1.000000e+30 : f32
    %70 = vector.broadcast %cst_26 : f32 to vector<16x8xf32>
    %71 = arith.select %43, %69, %70 : vector<16x8xi1>, vector<16x8xf32>
    %cst_27 = arith.constant dense<0xFF800000> : vector<16xf32>
    %72 = vector.multi_reduction <maximumf>, %71, %cst_27 [1] : vector<16x8xf32> to vector<16xf32>
    %73 = vector.shape_cast %72 : vector<16xf32> to vector<16x1xf32>
    %74 = vector.broadcast %73 : vector<16x1xf32> to vector<16x8xf32>
    %75 = arith.subf %71, %74 : vector<16x8xf32>
    %76 = math.exp %75 : vector<16x8xf32>
    %cst_28 = arith.constant dense<0.000000e+00> : vector<16xf32>
    %77 = vector.multi_reduction <add>, %76, %cst_28 [1] : vector<16x8xf32> to vector<16xf32>
    %78 = vector.shape_cast %77 : vector<16xf32> to vector<16x1xf32>
    %79 = vector.broadcast %78 : vector<16x1xf32> to vector<16x8xf32>
    %80 = arith.divf %76, %79 : vector<16x8xf32>
    %cst_29 = arith.constant dense<0.000000e+00> : vector<16x8xf32>
    %81 = tpu.matmul %80, %68, %cst_29 {dimension_numbers = #tpu.dot_dimension_numbers<[1], [0], [0], [1], [0, 0, 1, 1], [], []>} : vector<16x8xf32>, vector<8x8xf32>, vector<16x8xf32> -> vector<16x8xf32>
    %82 = vector.extract_strided_slice %81 {offsets = [0, 0], sizes = [8, 8], strides = [1, 1]} : vector<16x8xf32> to vector<8x8xf32>
    %83 = vector.extract_strided_slice %81 {offsets = [8, 0], sizes = [8, 8], strides = [1, 1]} : vector<16x8xf32> to vector<8x8xf32>
    %84 = tpu.concatenate %62, %63, %82, %83 in 1 : vector<8x8xf32>, vector<8x8xf32>, vector<8x8xf32>, vector<8x8xf32> -> vector<8x32xf32>
    %85 = vector.extract_strided_slice %23 {offsets = [8, 0], sizes = [8, 8], strides = [1, 1]} : vector<16x32xf32> to vector<8x8xf32>
    %86 = vector.extract_strided_slice %23 {offsets = [8, 8], sizes = [8, 8], strides = [1, 1]} : vector<16x32xf32> to vector<8x8xf32>
    %87 = tpu.concatenate %85, %86 in 0 : vector<8x8xf32>, vector<8x8xf32> -> vector<16x8xf32>
    %88 = vector.extract_strided_slice %24 {offsets = [8, 0], sizes = [8, 8], strides = [1, 1]} : vector<16x16xf32> to vector<8x8xf32>
    %89 = vector.extract_strided_slice %4 {offsets = [8, 0], sizes = [8, 8], strides = [1, 1]} : vector<16x16xf32> to vector<8x8xf32>
    %cst_30 = arith.constant dense<0.000000e+00> : vector<16x8xf32>
    %90 = tpu.matmul %87, %88, %cst_30 {dimension_numbers = #tpu.dot_dimension_numbers<[1], [1], [0], [0], [0, 0, 1, 0], [], []>} : vector<16x8xf32>, vector<8x8xf32>, vector<16x8xf32> -> vector<16x8xf32>
    %cst_31 = arith.constant -1.000000e+30 : f32
    %91 = vector.broadcast %cst_31 : f32 to vector<16x8xf32>
    %92 = arith.select %43, %90, %91 : vector<16x8xi1>, vector<16x8xf32>
    %cst_32 = arith.constant dense<0xFF800000> : vector<16xf32>
    %93 = vector.multi_reduction <maximumf>, %92, %cst_32 [1] : vector<16x8xf32> to vector<16xf32>
    %94 = vector.shape_cast %93 : vector<16xf32> to vector<16x1xf32>
    %95 = vector.broadcast %94 : vector<16x1xf32> to vector<16x8xf32>
    %96 = arith.subf %92, %95 : vector<16x8xf32>
    %97 = math.exp %96 : vector<16x8xf32>
    %cst_33 = arith.constant dense<0.000000e+00> : vector<16xf32>
    %98 = vector.multi_reduction <add>, %97, %cst_33 [1] : vector<16x8xf32> to vector<16xf32>
    %99 = vector.shape_cast %98 : vector<16xf32> to vector<16x1xf32>
    %100 = vector.broadcast %99 : vector<16x1xf32> to vector<16x8xf32>
    %101 = arith.divf %97, %100 : vector<16x8xf32>
    %cst_34 = arith.constant dense<0.000000e+00> : vector<16x8xf32>
    %102 = tpu.matmul %101, %89, %cst_34 {dimension_numbers = #tpu.dot_dimension_numbers<[1], [0], [0], [1], [0, 0, 1, 1], [], []>} : vector<16x8xf32>, vector<8x8xf32>, vector<16x8xf32> -> vector<16x8xf32>
    %103 = vector.extract_strided_slice %102 {offsets = [0, 0], sizes = [8, 8], strides = [1, 1]} : vector<16x8xf32> to vector<8x8xf32>
    %104 = vector.extract_strided_slice %102 {offsets = [8, 0], sizes = [8, 8], strides = [1, 1]} : vector<16x8xf32> to vector<8x8xf32>
    %105 = vector.extract_strided_slice %23 {offsets = [8, 16], sizes = [8, 8], strides = [1, 1]} : vector<16x32xf32> to vector<8x8xf32>
    %106 = vector.extract_strided_slice %23 {offsets = [8, 24], sizes = [8, 8], strides = [1, 1]} : vector<16x32xf32> to vector<8x8xf32>
    %107 = tpu.concatenate %105, %106 in 0 : vector<8x8xf32>, vector<8x8xf32> -> vector<16x8xf32>
    %108 = vector.extract_strided_slice %24 {offsets = [8, 8], sizes = [8, 8], strides = [1, 1]} : vector<16x16xf32> to vector<8x8xf32>
    %109 = vector.extract_strided_slice %4 {offsets = [8, 8], sizes = [8, 8], strides = [1, 1]} : vector<16x16xf32> to vector<8x8xf32>
    %cst_35 = arith.constant dense<0.000000e+00> : vector<16x8xf32>
    %110 = tpu.matmul %107, %108, %cst_35 {dimension_numbers = #tpu.dot_dimension_numbers<[1], [1], [0], [0], [0, 0, 1, 0], [], []>} : vector<16x8xf32>, vector<8x8xf32>, vector<16x8xf32> -> vector<16x8xf32>
    %cst_36 = arith.constant -1.000000e+30 : f32
    %111 = vector.broadcast %cst_36 : f32 to vector<16x8xf32>
    %112 = arith.select %43, %110, %111 : vector<16x8xi1>, vector<16x8xf32>
    %cst_37 = arith.constant dense<0xFF800000> : vector<16xf32>
    %113 = vector.multi_reduction <maximumf>, %112, %cst_37 [1] : vector<16x8xf32> to vector<16xf32>
    %114 = vector.shape_cast %113 : vector<16xf32> to vector<16x1xf32>
    %115 = vector.broadcast %114 : vector<16x1xf32> to vector<16x8xf32>
    %116 = arith.subf %112, %115 : vector<16x8xf32>
    %117 = math.exp %116 : vector<16x8xf32>
    %cst_38 = arith.constant dense<0.000000e+00> : vector<16xf32>
    %118 = vector.multi_reduction <add>, %117, %cst_38 [1] : vector<16x8xf32> to vector<16xf32>
    %119 = vector.shape_cast %118 : vector<16xf32> to vector<16x1xf32>
    %120 = vector.broadcast %119 : vector<16x1xf32> to vector<16x8xf32>
    %121 = arith.divf %117, %120 : vector<16x8xf32>
    %cst_39 = arith.constant dense<0.000000e+00> : vector<16x8xf32>
    %122 = tpu.matmul %121, %109, %cst_39 {dimension_numbers = #tpu.dot_dimension_numbers<[1], [0], [0], [1], [0, 0, 1, 1], [], []>} : vector<16x8xf32>, vector<8x8xf32>, vector<16x8xf32> -> vector<16x8xf32>
    %123 = vector.extract_strided_slice %122 {offsets = [0, 0], sizes = [8, 8], strides = [1, 1]} : vector<16x8xf32> to vector<8x8xf32>
    %124 = vector.extract_strided_slice %122 {offsets = [8, 0], sizes = [8, 8], strides = [1, 1]} : vector<16x8xf32> to vector<8x8xf32>
    %125 = tpu.concatenate %103, %104, %123, %124 in 1 : vector<8x8xf32>, vector<8x8xf32>, vector<8x8xf32>, vector<8x8xf32> -> vector<8x32xf32>
    %126 = tpu.concatenate %84, %125 in 0 : vector<8x32xf32>, vector<8x32xf32> -> vector<16x32xf32>
    %c0_40 = arith.constant 0 : index
    %c0_41 = arith.constant 0 : index
    %127 = vector.load %arg2[%c0_40, %c0_41] : memref<32x32xf32, #tpu.memory_space<vmem>>, vector<32x32xf32>
    %cst_42 = arith.constant dense<0.000000e+00> : vector<16x32xf32>
    %128 = tpu.matmul %126, %127, %cst_42 {dimension_numbers = #tpu.dot_dimension_numbers<[1], [1], [0], [0], [0, 0, 1, 0], [], []>} : vector<16x32xf32>, vector<32x32xf32>, vector<16x32xf32> -> vector<16x32xf32>
    %c0_43 = arith.constant 0 : index
    %c0_44 = arith.constant 0 : index
    %129 = vector.load %arg5[%c0_43, %c0_44] : memref<16x32xf32, #tpu.memory_space<vmem>>, vector<16x32xf32>
    tpu.vector_store %arg5[%c0_43, %c0_44], %128 {strides = array<i32>} : memref<16x32xf32, #tpu.memory_space<vmem>>, vector<16x32xf32>,
    return
  }
}

</mosaic_0001>

<bundles_post_ra>
// kernel: tile.23
= control target key start
LH: loop header
LB: loop body
LE: loop exit
PB: predicated region body
PF: predicated region fallthrough
CT: control target
= control target key end

     0   :  { %s154_s0 = inlined_call_operand.vmem [shape: f32[8,8], index: 0, kind: input, shape index: {}]   ;;  %s155_s1 = inlined_call_operand.vmem [shape: f32[2,8,6,8], index: 1, kind: output, shape index: {}]  }
   0x1   :  { %v4_v0 = vld [vmem:[%s154_s0] ss:$0 sm:$0xff]  ;;  %v51_v1 = vld [vmem:[%s154_s0 + $0x1] ss:$0 sm:$0xff]  ;;  %v54_v2 = vld [vmem:[%s154_s0 + $0x2] ss:$0 sm:$0xff] }
   0x2   :  { %5 = vst [vmem:[%s155_s1] sm:$0xff] %v4_v0  ;;  %50 = vst [vmem:[%s155_s1 + $0x40] sm:$0xff] %v4_v0  ;;  %v57_v3 = vld [vmem:[%s154_s0 + $0x3] ss:$0 sm:$0xff]  ;;  %v60_v4 = vld [vmem:[%s154_s0 + $0x4] ss:$0 sm:$0xff] }
   0x3   :  { %52 = vst [vmem:[%s155_s1 + $0x8] sm:$0xff] %v51_v1  ;;  %53 = vst [vmem:[%s155_s1 + $0x48] sm:$0xff] %v51_v1  ;;  %v63_v5 = vld [vmem:[%s154_s0 + $0x5] ss:$0 sm:$0xff]  ;;  %v66_v6 = vld [vmem:[%s154_s0 + $0x6] ss:$0 sm:$0xff] }
   0x4   :  { %55 = vst [vmem:[%s155_s1 + $0x10] sm:$0xff] %v54_v2  ;;  %56 = vst [vmem:[%s155_s1 + $0x50] sm:$0xff] %v54_v2  ;;  %v69_v7 = vld [vmem:[%s154_s0 + $0x7] ss:$0 sm:$0xff] }
   0x5   :  { %58 = vst [vmem:[%s155_s1 + $0x18] sm:$0xff] %v57_v3  ;;  %59 = vst [vmem:[%s155_s1 + $0x58] sm:$0xff] %v57_v3 }
   0x6   :  { %61 = vst [vmem:[%s155_s1 + $0x20] sm:$0xff] %v60_v4  ;;  %62 = vst [vmem:[%s155_s1 + $0x60] sm:$0xff] %v60_v4 }
   0x7   :  { %64 = vst [vmem:[%s155_s1 + $0x28] sm:$0xff] %v63_v5  ;;  %65 = vst [vmem:[%s155_s1 + $0x68] sm:$0xff] %v63_v5 }
   0x8   :  { %67 = vst [vmem:[%s155_s1 + $0x30] sm:$0xff] %v66_v6  ;;  %68 = vst [vmem:[%s155_s1 + $0x70] sm:$0xff] %v66_v6 }
   0x9   :  { %70 = vst [vmem:[%s155_s1 + $0x38] sm:$0xff] %v69_v7  ;;  %71 = vst [vmem:[%s155_s1 + $0x78] sm:$0xff] %v69_v7 }

// kernel: tile.33
= control target key start
LH: loop header
LB: loop body
LE: loop exit
PB: predicated region body
PF: predicated region fallthrough
CT: control target
= control target key end

     0   :  { %s22_s0 = inlined_call_operand.vmem [shape: f32[8], index: 0, kind: input, shape index: {}]   ;;  %s23_s1 = inlined_call_operand.vmem [shape: f32[4,8], index: 1, kind: output, shape index: {}]  }
   0x1   :  { %v4_v0 = vld [vmem:[%s22_s0] ss:$0 sm:$0xff] }
   0x2   :  { %5 = vst [vmem:[%s23_s1] sm:$0xf] %v4_v0 }

// kernel: tile.38
= control target key start
LH: loop header
LB: loop body
LE: loop exit
PB: predicated region body
PF: predicated region fallthrough
CT: control target
= control target key end

     0   :  { %s22_s0 = inlined_call_operand.vmem [shape: f32[8], index: 0, kind: input, shape index: {}]   ;;  %s23_s1 = inlined_call_operand.vmem [shape: f32[2,8], index: 1, kind: output, shape index: {}]  }
   0x1   :  { %v4_v0 = vld [vmem:[%s22_s0] ss:$0 sm:$0xff] }
   0x2   :  { %5 = vst [vmem:[%s23_s1] sm:$0x3] %v4_v0 }

// kernel: llama_attention_forward.1
= control target key start
LH: loop header
LB: loop body
LE: loop exit
PB: predicated region body
PF: predicated region fallthrough
CT: control target
= control target key end

     0   :  { %vm31_vm0 = vcmask 261120   ;;  %s1848_s0 = inlined_call_operand.vmem [shape: f32[16,32], index: 0, kind: input, shape index: {}]   ;;  %s1849_s1 = inlined_call_operand.vmem [shape: f32[64,32], index: 1, kind: input, shape index: {}]   ;;  %s1850_s2 = inlined_call_operand.vmem [shape: f32[32,32], index: 2, kind: input, shape index: {}]   ;;  %s1851_s3 = inlined_call_operand.vmem [shape: f32[2,16,48], index: 3, kind: input, shape index: {}]   ;;  %s1852_s4 = inlined_call_operand.vmem [shape: f32[2,48,48], index: 4, kind: input, shape index: {}]   ;;  %s1853_s5 = inlined_call_operand.hbm [shape: f32[16,32], index: 5, kind: output, shape index: {}]  }
   0x1   :  { %v30_v0 = vld [vmem:[%s1849_s1 + $0x38] sm:$0xff]  ;;  %v29_v1 = vld [vmem:[%s1849_s1 + $0x30] sm:$0xff]  ;;  %v21_v2 = vld [vmem:[%s1848_s0] sm:$0xff] }
   0x2   :  { %1393 = vmatprep.subr.msk.mxu0 %vm31_vm0, %v30_v0  ;;  %1409 = vmatprep.mubr.msk.f32.mxu0 %vm31_vm0, %v21_v2  ;;  %v144_v3 = vld [vmem:[%s1852_s4 + $0x28] sm:$0xff]  ;;  %v143_v4 = vld [vmem:[%s1852_s4 + $0x20] sm:$0xff] }
   0x3   :  { %1394 = vmatpush3.xpose.msk.msra.mxu0 %vm31_vm0, %v30_v0  ;;  %v28_v5 = vld [vmem:[%s1849_s1 + $0x28] sm:$0xff]  ;;  %1412 = vmatprep.subr.mxu1 %v144_v3 }
   0x4   :  { %1395 = vmatprep.subr.msk.mxu0 %vm31_vm0, %v29_v1 }
   0x5   :  { %10 = vsyncpa [#allocation3], 0  ;;  %1413 = vmatpush3.msra.mxu1 %v144_v3  ;;  %v142_v6 = vld [vmem:[%s1852_s4 + $0x18] sm:$0xff]  ;;  %v27_v7 = vld [vmem:[%s1849_s1 + $0x20] sm:$0xff]  ;;  %vm145_vm1 = vcmask 392192   ;;  %vm366_vm2 = vcmask 64512   ;;  %v330_v48 = vlaneseq }
   0x6   :  { %1414 = vmatprep.subr.mxu1 %v143_v4  ;;  %v26_v8 = vld [vmem:[%s1849_s1 + $0x18] sm:$0xff]  ;;  %v25_v9 = vld [vmem:[%s1849_s1 + $0x10] sm:$0xff]  ;;  %v24_v10 = vld [vmem:[%s1849_s1 + $0x8] sm:$0xff]  ;;  %s1562_s17 = smov 96   ;;  %s1563_s18 = smov 120   ;;  %vm765_vm5 = vcmask 130048  }
   0x7   :  { %1396 = vmatpush3.xpose.msk.msra.mxu0 %vm31_vm0, %v29_v1  ;;  %1415 = vmatpush3.msra.mxu1 %v143_v4  ;;  %v23_v11 = vld [vmem:[%s1849_s1] sm:$0xff]  ;;  %v22_v12 = vld [vmem:[%s1848_s0 + $0x8] sm:$0xff]  ;;  %v141_v13 = vld [vmem:[%s1852_s4 + $0x10] sm:$0xff]  ;;  %v331_v49 = vshrl.u32 %v330_v48, 7  ;;  %v358_v53 = vand.u32 127, %v330_v48  ;;  %s1565_s19 = smov 88  }
   0x8   :  { %1397 = vmatprep.subr.msk.mxu0 %vm31_vm0, %v28_v5  ;;  %1416 = vmatprep.subr.mxu1 %v142_v6  ;;  %v140_v14 = vld [vmem:[%s1852_s4 + $0x8] sm:$0xff]  ;;  %v139_v15 = vld [vmem:[%s1852_s4] sm:$0xff]  ;;  %v1306_v20 = vld [vmem:[%s1852_s4 + $0x58] sm:$0xff]  ;;  %s1566_s20 = smov 112   ;;  %s1567_s21 = smov 72   ;;  %vm767_vm6 = vcmask 195584  }
   0x9   :  { %1417 = vmatpush3.msra.mxu1 %v142_v6  ;;  %v1305_v21 = vld [vmem:[%s1852_s4 + $0x50] sm:$0xff]  ;;  %v1304_v22 = vld [vmem:[%s1852_s4 + $0x48] sm:$0xff]  ;;  %v1303_v23 = vld [vmem:[%s1852_s4 + $0x40] sm:$0xff]  ;;  %v332_v50 = vadd.s32 8, %v331_v49  ;;  %v337_v51 = vand.u32 7, %v331_v49  ;;  %s1568_s1 = smov 8  }
   0xa   :  { %1418 = vmatprep.subr.mxu1 %v141_v13  ;;  %v1302_v24 = vld [vmem:[%s1852_s4 + $0x38] sm:$0xff]  ;;  %v1301_v25 = vld [vmem:[%s1852_s4 + $0x30] sm:$0xff]  ;;  %v320_v34 = vld [vmem:[%s1851_s3 + $0x8] sm:$0xff]  ;;  %s1569_s22 = smov 16   ;;  %s1570_s23 = smov 24  }
   0xb   :  { %1398 = vmatpush3.xpose.msk.msra.mxu0 %vm31_vm0, %v28_v5  ;;  %1419 = vmatpush3.msra.mxu1 %v141_v13  ;;  %v1310_v35 = vld [vmem:[%s1851_s3 + $0x18] sm:$0xff]  ;;  %v319_v37 = vld [vmem:[%s1851_s3] sm:$0xff]  ;;  %v1309_v38 = vld [vmem:[%s1851_s3 + $0x10] sm:$0xff]  ;;  %v344_v52 = vand.u32 7, %v332_v50  ;;  %vm1721_vm3 = vcmp.le.s32.totalorder %v358_v53, %v337_v51  ;;  %s1564_s3 = smov 80  }
   0xc   :  { %1399 = vmatprep.subr.msk.mxu0 %vm31_vm0, %v27_v7  ;;  %1420 = vmatprep.subr.mxu1 %v140_v14 }
   0xd   :  { %1421 = vmatpush3.msra.mxu1 %v140_v14  ;;  %vm1725_vm4 = vcmp.le.s32.totalorder %v358_v53, %v344_v52 }
   0xe   :  { %1422 = vmatprep.subr.mxu1 %v139_v15 }
   0xf   :  { %1400 = vmatpush3.xpose.msk.msra.mxu0 %vm31_vm0, %v27_v7  ;;  %1423 = vmatpush3.msra.mxu1 %v139_v15 }
  0x10   :  { %1401 = vmatprep.subr.msk.mxu0 %vm31_vm0, %v26_v8  ;;  %1427 = vmatprep.subr.mxu1 %v1306_v20 }
  0x13   :  { %1402 = vmatpush3.xpose.msk.msra.mxu0 %vm31_vm0, %v26_v8 }
  0x14   :  { %1403 = vmatprep.subr.msk.mxu0 %vm31_vm0, %v25_v9 }
  0x17   :  { %1404 = vmatpush3.xpose.msk.msra.mxu0 %vm31_vm0, %v25_v9 }
  0x18   :  { %1405 = vmatprep.subr.msk.mxu0 %vm31_vm0, %v24_v10 }
  0x1b   :  { %1406 = vmatpush3.xpose.msk.msra.mxu0 %vm31_vm0, %v24_v10 }
  0x1c   :  { %1407 = vmatprep.subr.msk.mxu0 %vm31_vm0, %v23_v11 }
  0x1f   :  { %1408 = vmatpush3.xpose.msk.msra.mxu0 %vm31_vm0, %v23_v11 }
  0x22   :  { %1410 = vmatmul.mubr.msk.f32.vlgmr.msra.gmra.mxu0 %vm31_vm0, %v22_v12 }
  0xe2   :  { %v1669_v16 = vpop.f32.mrf.mxu0 }
  0xe3   :  { %v138_v19 = vmul.f32 %v1669_v16, %v1669_v16 }
  0xe4   :  { %v1671_v17 = vpop.f32.mrf.mxu0 }
  0xe5   :  { %v137_v18 = vmul.f32 %v1671_v17, %v1671_v17 }
  0xe7   :  { %1424 = vmatprep.mubr.msk.f32.mxu1 %vm145_vm1, %v137_v18 }
  0xe8   :  { %1425 = vmatmul.mubr.msk.f32.vlgmr.msra.gmra.mxu1 %vm145_vm1, %v138_v19 }
  0xe9   :  { %1428 = vmatpush3.msra.mxu1 %v1306_v20 }
  0xea   :  { %1429 = vmatprep.subr.mxu1 %v1305_v21 }
  0xeb   :  { %1430 = vmatpush3.msra.mxu1 %v1305_v21 }
  0xec   :  { %1431 = vmatprep.subr.mxu1 %v1304_v22 }
  0xed   :  { %1432 = vmatpush3.msra.mxu1 %v1304_v22 }
  0xee   :  { %1433 = vmatprep.subr.mxu1 %v1303_v23 }
  0xef   :  { %1434 = vmatpush3.msra.mxu1 %v1303_v23 }
  0xf0   :  { %1435 = vmatprep.subr.mxu1 %v1302_v24 }
  0xf1   :  { %1436 = vmatpush3.msra.mxu1 %v1302_v24 }
  0xf2   :  { %1437 = vmatprep.subr.mxu1 %v1301_v25 }
  0xf3   :  { %1438 = vmatpush3.msra.mxu1 %v1301_v25 }
 0x1a8   :  { %v1426_v26 = vpop.f32.mrf.mxu1 }
 0x1a9   :  { %v224_v27 = vadd.f32 1e-06, %v1426_v26 }
 0x1aa   :  { %v218_v28 = vpop.f32.mrf.mxu1 }
 0x1ab   :  { %v219_v29 = vadd.f32 1e-06, %v218_v28  ;;  %1504 = vrsqrt.f32 %v224_v27 }
 0x1ad   :  { %1506 = vrsqrt.f32 %v219_v29 }
 0x1b8   :  { %v1505_v30 = vpop.eup %1504 }
 0x1b9   :  { %v230_v33 = vmul.f32 %v1505_v30, %v1669_v16 }
 0x1ba   :  { %v1507_v31 = vpop.eup %1506 }
 0x1bb   :  { %v229_v32 = vmul.f32 %v1507_v31, %v1671_v17  ;;  %v322_v39 = vmul.f32 %v320_v34, %v230_v33 }
 0x1bd   :  { %1439 = vmatprep.mubr.msk.f32.mxu1 %vm145_vm1, %v229_v32  ;;  %v321_v43 = vmul.f32 %v319_v37, %v229_v32 }
 0x1be   :  { %1440 = vmatmul.mubr.msk.f32.vlgmr.msra.gmra.mxu1 %vm145_vm1, %v230_v33 }
 0x27e   :  { %v1441_v36 = vpop.f32.mrf.mxu1 }
 0x27f   :  { %v327_v40 = vmul.f32 %v1441_v36, %v1310_v35 }
 0x280   :  { %v310_v41 = vpop.f32.mrf.mxu1 }
 0x281   :  { %v1713_v42 = vadd.f32 %v327_v40, %v322_v39  ;;  %v326_v44 = vmul.f32 %v1309_v38, %v310_v41 }
 0x283   :  { %v328_v45 = vadd.f32 %v326_v44, %v321_v43 }
 0x285   :  { %364 = vrot.lane.b32.xlu0 %v328_v45, %s1562_s17  ;;  %1444 = vmatprep.mubr.msk.f32.mxu1 %vm366_vm2, %v328_v45 }
 0x289   :  { %362 = vrot.lane.b32.xlu0 %v328_v45, %s1563_s18 }
 0x2f7   :  { %v365_v46 = vpop.permute.xlu0 %364 }
 0x2f8   :  { %1442 = vmatprep.subr.msk.mxu1 %vm366_vm2, %v365_v46 }
 0x2f9   :  { %1443 = vmatpush3.xpose.msk.msra.mxu1 %vm366_vm2, %v365_v46 }
 0x2fb   :  { %v363_v47 = vpop.permute.xlu0 %362 }
 0x2fc   :  { %1445 = vmatmul.mubr.msk.f32.vlgmr.msra.gmra.mxu1 %vm366_vm2, %v363_v47 }
 0x3bc   :  { %v1446_v54 = vpop.f32.mrf.mxu1 }
 0x3bd   :  { %v449_v60 = vsel %vm1725_vm4, %v1446_v54, -1e+30 }
 0x3be   :  { %v439_v57 = vpop.f32.mrf.mxu1  ;;  %v453_v61 = vsel %vm366_vm2, %v449_v60, -inf }
 0x3bf   :  { %v448_v58 = vsel %vm1721_vm3, %v439_v57, -1e+30 }
 0x3c0   :  { %v450_v59 = vsel %vm366_vm2, %v448_v58, -inf }
 0x3c1   :  { %451 = vmax.xlane.f32.xlu1 %v450_v59 }
 0x3c5   :  { %454 = vmax.xlane.f32.xlu1 %v453_v61 }
 0x44a   :  { %v452_v62 = vpop.xlane.xlu1 %451 }
 0x44b   :  { %v456_v63 = vsub.f32 %v448_v58, %v452_v62 }
 0x44d   :  { %v458_v0 = vmul.f32 1.442695, %v456_v63 }
 0x44e   :  { %v455_v1 = vpop.xlane.xlu1 %454 }
 0x44f   :  { %1508 = vpow2.f32 %v458_v0  ;;  %v457_v2 = vsub.f32 %v449_v60, %v455_v1 }
 0x451   :  { %v460_v3 = vmul.f32 1.442695, %v457_v2 }
 0x453   :  { %1510 = vpow2.f32 %v460_v3 }
 0x45c   :  { %v1509_v4 = vpop.eup %1508 }
 0x45d   :  { %v462_v5 = vsel %vm366_vm2, %v1509_v4, 0.0 }
 0x45e   :  { %463 = vadd.xlane.f32.xlu0 %v462_v5 }
 0x460   :  { %v1511_v6 = vpop.eup %1510 }
 0x461   :  { %v465_v7 = vsel %vm366_vm2, %v1511_v6, 0.0 }
 0x462   :  { %466 = vadd.xlane.f32.xlu1 %v465_v7 }
 0x473   :  { %473 = vrot.lane.b32.xlu1 %v1671_v17, %s1564_s3 }
 0x477   :  { %561 = vrot.lane.b32.xlu1 %v328_v45, %s1565_s19 }
 0x47b   :  { %557 = vrot.lane.b32.xlu1 %v328_v45, %s1566_s20 }
 0x47f   :  { %559 = vrot.lane.b32.xlu1 %v363_v47, %s1566_s20 }
 0x4e7   :  { %v464_v8 = vpop.xlane.xlu0 %463 }
 0x4e8   :  { %1512 = vrcp.f32 %v464_v8 }
 0x4eb   :  { %v467_v9 = vpop.xlane.xlu1 %466 }
 0x4ec   :  { %1514 = vrcp.f32 %v467_v9 }
 0x4ef   :  { %v474_v10 = vpop.permute.xlu1 %473 }
 0x4f0   :  { %1447 = vmatprep.subr.mxu1 %v474_v10 }
 0x4f1   :  { %1448 = vmatpush3.msra.mxu1 %v474_v10 }
 0x4f3   :  { %v562_v11 = vpop.permute.xlu1 %561 }
 0x4f4   :  { %1452 = vmatprep.subr.msk.mxu1 %vm366_vm2, %v562_v11 }
 0x4f5   :  { %v1513_v12 = vpop.eup %1512 }
 0x4f6   :  { %v469_v13 = vmul.f32 %v1513_v12, %v1509_v4 }
 0x4f7   :  { %v558_v15 = vpop.permute.xlu1 %557 }
 0x4f8   :  { %1449 = vmatprep.mubr.msk.f32.mxu1 %vm366_vm2, %v469_v13 }
 0x4f9   :  { %v1515_v14 = vpop.eup %1514 }
 0x4fa   :  { %v471_v18 = vmul.f32 %v1515_v14, %v1511_v6 }
 0x4fb   :  { %v560_v19 = vpop.permute.xlu1 %559 }
 0x4fc   :  { %1450 = vmatmul.mubr.msk.f32.vlgmr.msra.gmra.mxu1 %vm366_vm2, %v471_v18 }
 0x4fd   :  { %1453 = vmatpush3.xpose.msk.msra.mxu1 %vm366_vm2, %v562_v11  ;;  %1454 = vmatprep.mubr.msk.f32.mxu1 %vm366_vm2, %v558_v15 }
 0x500   :  { %1455 = vmatmul.mubr.msk.f32.vlgmr.msra.gmra.mxu1 %vm366_vm2, %v560_v19 }
 0x5bc   :  { %v1748_v20 = vpop.f32.mrf.mxu1 }
 0x5be   :  { %v1750_v21 = vpop.f32.mrf.mxu1 }
 0x5c0   :  { %v1456_v22 = vpop.f32.mrf.mxu1 }
 0x5c1   :  { %v645_v23 = vsel %vm1725_vm4, %v1456_v22, -1e+30 }
 0x5c2   :  { %v635_v24 = vpop.f32.mrf.mxu1  ;;  %v649_v25 = vsel %vm366_vm2, %v645_v23, -inf }
 0x5c3   :  { %v644_v26 = vsel %vm1721_vm3, %v635_v24, -1e+30  ;;  %650 = vmax.xlane.f32.xlu1 %v649_v25 }
 0x5c4   :  { %v646_v27 = vsel %vm366_vm2, %v644_v26, -inf }
 0x5c5   :  { %647 = vmax.xlane.f32.xlu0 %v646_v27 }
 0x5d4   :  { %668 = vrot.lane.b32.xlu1 %v1671_v17, %s1567_s21 }
 0x5db   :  { %770 = vrot.lane.b32.xlu0 %v1713_v42, %s1563_s18 }
 0x64c   :  { %v651_v28 = vpop.xlane.xlu1 %650 }
 0x64d   :  { %v653_v29 = vsub.f32 %v645_v23, %v651_v28 }
 0x64e   :  { %v648_v30 = vpop.xlane.xlu0 %647 }
 0x64f   :  { %v656_v31 = vmul.f32 1.442695, %v653_v29  ;;  %v652_v32 = vsub.f32 %v644_v26, %v648_v30 }
 0x650   :  { %v669_v33 = vpop.permute.xlu1 %668 }
 0x651   :  { %1516 = vpow2.f32 %v656_v31  ;;  %v654_v34 = vmul.f32 1.442695, %v652_v32  ;;  %1457 = vmatprep.subr.mxu1 %v669_v33 }
 0x652   :  { %1458 = vmatpush3.msra.mxu1 %v669_v33  ;;  %v771_v38 = vpop.permute.xlu0 %770 }
 0x653   :  { %1518 = vpow2.f32 %v654_v34 }
 0x65e   :  { %v1517_v35 = vpop.eup %1516 }
 0x65f   :  { %v661_v36 = vsel %vm366_vm2, %v1517_v35, 0.0 }
 0x660   :  { %v1519_v37 = vpop.eup %1518  ;;  %662 = vadd.xlane.f32.xlu1 %v661_v36 }
 0x661   :  { %v658_v17 = vsel %vm366_vm2, %v1519_v37, 0.0 }
 0x662   :  { %659 = vadd.xlane.f32.xlu0 %v658_v17 }
 0x671   :  { %968 = vrot.lane.b32.xlu1 %v1713_v42, %s1565_s19 }
 0x675   :  { %964 = vrot.lane.b32.xlu1 %v1713_v42, %s1566_s20 }
 0x678   :  { %772 = vrot.lane.b32.xlu0 %v1713_v42, %s1562_s17 }
 0x679   :  { %966 = vrot.lane.b32.xlu1 %v771_v38, %s1566_s20 }
 0x6e9   :  { %v663_v39 = vpop.xlane.xlu1 %662 }
 0x6ea   :  { %1520 = vrcp.f32 %v663_v39 }
 0x6eb   :  { %v660_v40 = vpop.xlane.xlu0 %659 }
 0x6ec   :  { %1522 = vrcp.f32 %v660_v40  ;;  %v1176_v40 = vld [vmem:[%s1850_s2 + $0x10] sm:$0xff] }
 0x6ed   :  { %v969_v41 = vpop.permute.xlu1 %968 }
 0x6ee   :  { %1472 = vmatprep.subr.msk.mxu0 %vm366_vm2, %v969_v41 }
 0x6ef   :  { %1473 = vmatpush3.xpose.msk.msra.mxu0 %vm366_vm2, %v969_v41  ;;  %v773_v43 = vpop.permute.xlu0 %772  ;;  %v1175_v41 = vld [vmem:[%s1850_s2 + $0x8] sm:$0xff] }
 0x6f0   :  { %1462 = vmatprep.subr.msk.mxu1 %vm366_vm2, %v773_v43 }
 0x6f1   :  { %v965_v44 = vpop.permute.xlu1 %964 }
 0x6f2   :  { %1474 = vmatprep.mubr.msk.f32.mxu0 %vm366_vm2, %v965_v44 }
 0x6f5   :  { %v967_v45 = vpop.permute.xlu1 %966 }
 0x6f6   :  { %1475 = vmatmul.mubr.msk.f32.vlgmr.msra.gmra.mxu0 %vm366_vm2, %v967_v45 }
 0x6f7   :  { %v1521_v46 = vpop.eup %1520 }
 0x6f8   :  { %v667_v49 = vmul.f32 %v1521_v46, %v1517_v35 }
 0x6f9   :  { %v1523_v47 = vpop.eup %1522 }
 0x6fa   :  { %v665_v48 = vmul.f32 %v1523_v47, %v1519_v37 }
 0x6fc   :  { %1459 = vmatprep.mubr.msk.f32.mxu1 %vm366_vm2, %v665_v48 }
 0x6fd   :  { %1460 = vmatmul.mubr.msk.f32.vlgmr.msra.gmra.mxu1 %vm366_vm2, %v667_v49 }
 0x6fe   :  { %1463 = vmatpush3.xpose.msk.msra.mxu1 %vm366_vm2, %v773_v43  ;;  %1464 = vmatprep.mubr.msk.f32.mxu1 %vm366_vm2, %v1713_v42  ;;  %v1174_v43 = vld [vmem:[%s1850_s2] sm:$0xff] }
 0x701   :  { %1465 = vmatmul.mubr.msk.f32.vlgmr.msra.gmra.mxu1 %vm366_vm2, %v771_v38 }
 0x7b6   :  { %v1476_v51 = vpop.f32.mrf.mxu0 }
 0x7b7   :  { %v1052_v60 = vsel %vm1725_vm4, %v1476_v51, -1e+30 }
 0x7b8   :  { %v1042_v57 = vpop.f32.mrf.mxu0  ;;  %v1056_v63 = vsel %vm366_vm2, %v1052_v60, -inf }
 0x7b9   :  { %v1051_v62 = vsel %vm1721_vm3, %v1042_v57, -1e+30 }
 0x7ba   :  { %v1053_v0 = vsel %vm366_vm2, %v1051_v62, -inf }
 0x7bd   :  { %v1461_v50 = vpop.f32.mrf.mxu1 }
 0x7bf   :  { %v743_v52 = vpop.f32.mrf.mxu1 }
 0x7c1   :  { %v1466_v53 = vpop.f32.mrf.mxu1 }
 0x7c2   :  { %v856_v54 = vsel %vm1725_vm4, %v1466_v53, -1e+30 }
 0x7c3   :  { %v846_v58 = vpop.f32.mrf.mxu1  ;;  %v860_v59 = vsel %vm366_vm2, %v856_v54, -inf }
 0x7c4   :  { %v855_v61 = vsel %vm1721_vm3, %v846_v58, -1e+30  ;;  %861 = vmax.xlane.f32.xlu0 %v860_v59 }
 0x7c5   :  { %v857_v42 = vsel %vm366_vm2, %v855_v61, -inf }
 0x7c6   :  { %858 = vmax.xlane.f32.xlu1 %v857_v42 }
 0x7c8   :  { %1057 = vmax.xlane.f32.xlu0 %v1056_v63 }
 0x7ca   :  { %1054 = vmax.xlane.f32.xlu1 %v1053_v0 }
 0x84d   :  { %v862_v1 = vpop.xlane.xlu0 %861 }
 0x84e   :  { %v864_v2 = vsub.f32 %v856_v54, %v862_v1 }
 0x84f   :  { %v859_v56 = vpop.xlane.xlu1 %858 }
 0x850   :  { %v863_v4 = vsub.f32 %v855_v61, %v859_v56  ;;  %v867_v6 = vmul.f32 1.442695, %v864_v2 }
 0x851   :  { %v1058_v3 = vpop.xlane.xlu0 %1057 }
 0x852   :  { %v1060_v5 = vsub.f32 %v1052_v60, %v1058_v3  ;;  %v865_v10 = vmul.f32 1.442695, %v863_v4 }
 0x853   :  { %v1055_v7 = vpop.xlane.xlu1 %1054 }
 0x854   :  { %v1063_v8 = vmul.f32 1.442695, %v1060_v5  ;;  %v1059_v9 = vsub.f32 %v1051_v62, %v1055_v7 }
 0x856   :  { %1524 = vpow2.f32 %v1063_v8  ;;  %v1061_v55 = vmul.f32 1.442695, %v1059_v9 }
 0x857   :  { %1526 = vpow2.f32 %v867_v6 }
 0x858   :  { %1528 = vpow2.f32 %v1061_v55 }
 0x859   :  { %1530 = vpow2.f32 %v865_v10 }
 0x863   :  { %v1525_v11 = vpop.eup %1524 }
 0x864   :  { %v1527_v12 = vpop.eup %1526  ;;  %v1068_v13 = vsel %vm366_vm2, %v1525_v11, 0.0 }
 0x865   :  { %v1529_v14 = vpop.eup %1528  ;;  %1069 = vadd.xlane.f32.xlu0 %v1068_v13  ;;  %v872_v19 = vsel %vm366_vm2, %v1527_v12, 0.0 }
 0x866   :  { %v1065_v15 = vsel %vm366_vm2, %v1529_v14, 0.0  ;;  %v1531_v18 = vpop.eup %1530 }
 0x867   :  { %1066 = vadd.xlane.f32.xlu1 %v1065_v15  ;;  %v869_v22 = vsel %vm366_vm2, %v1531_v18, 0.0 }
 0x869   :  { %873 = vadd.xlane.f32.xlu0 %v872_v19 }
 0x86b   :  { %870 = vadd.xlane.f32.xlu1 %v869_v22 }
 0x87c   :  { %880 = vrot.lane.b32.xlu1 %v1669_v16, %s1564_s3 }
 0x87f   :  { %1075 = vrot.lane.b32.xlu0 %v1669_v16, %s1567_s21 }
 0x880   :  { %753 = vrot.lane.b32.xlu1 %v1748_v20, %s1568_s1 }
 0x884   :  { %757 = vrot.lane.b32.xlu1 %v743_v52, %s1569_s22 }
 0x888   :  { %761 = vrot.lane.b32.xlu1 %v1461_v50, %s1570_s23 }
 0x8ee   :  { %v1070_v23 = vpop.xlane.xlu0 %1069 }
 0x8f0   :  { %v1067_v24 = vpop.xlane.xlu1 %1066 }
 0x8f1   :  { %1532 = vrcp.f32 %v1067_v24 }
 0x8f2   :  { %v874_v25 = vpop.xlane.xlu0 %873 }
 0x8f3   :  { %1534 = vrcp.f32 %v874_v25 }
 0x8f4   :  { %v871_v26 = vpop.xlane.xlu1 %870 }
 0x8f5   :  { %1536 = vrcp.f32 %v871_v26 }
 0x8f6   :  { %1538 = vrcp.f32 %v1070_v23  ;;  %v1076_v16 = vpop.permute.xlu0 %1075 }
 0x8f8   :  { %v881_v27 = vpop.permute.xlu1 %880 }
 0x8f9   :  { %1467 = vmatprep.subr.mxu1 %v881_v27 }
 0x8fa   :  { %1468 = vmatpush3.msra.mxu1 %v881_v27 }
 0x8fb   :  { %1477 = vmatprep.subr.mxu1 %v1076_v16 }
 0x8fc   :  { %v754_v20 = vpop.permute.xlu1 %753 }
 0x8fd   :  { %v764_v32 = vsel %vm366_vm2, %v1750_v21, %v754_v20  ;;  %v1177_v21 = vld [vmem:[%s1850_s2 + $0x18] sm:$0xff]  ;;  %s1571_s2 = smov [#allocation2]  }
 0x8fe   :  { %v1533_v28 = vpop.eup %1532  ;;  %1482 = vmatprep.subr.msk.mxu0 %vm31_vm0, %v1177_v21  ;;  %s1278_s6 = sshll.u32 %s1571_s2, 4  ;;  %s1279_s6 = int_to_ptr.vmem [resolvable:$true] %s1278_s6 }
 0x8ff   :  { %v1072_v38 = vmul.f32 %v1533_v28, %v1529_v14  ;;  %1483 = vmatpush3.xpose.msk.msra.mxu0 %vm31_vm0, %v1177_v21  ;;  %s1540_s7 = scalar_lea.vmem %s1279_s6, 256  ;;  %p1545_p1 = scmp.lt.s32.totalorder %s1279_s6, %s1279_s6 }
 0x900   :  { %v758_v29 = vpop.permute.xlu1 %757  ;;  %v1535_v30 = vpop.eup %1534  ;;  %1484 = vmatprep.subr.msk.mxu0 %vm31_vm0, %v1176_v40  ;;  %p1541_p0 = scmp.ne.s32.totalorder %s1279_s6, %s1540_s7  ;;  %p1546_p2 = scmp.lt.s32.totalorder %s1540_s7, %s1540_s7 }
 0x901   :  { %v766_v34 = vsel %vm765_vm5, %v764_v32, %v758_v29  ;;  %v878_v36 = vmul.f32 %v1535_v30, %v1527_v12 }
 0x902   :  { %v1537_v31 = vpop.eup %1536  ;;  %p1547_p3 = por %p1546_p2, %p1545_p1 }
 0x903   :  { %v876_v33 = vmul.f32 %v1537_v31, %v1531_v18  ;;  %v1539_v37 = vpop.eup %1538  ;;  %1485 = vmatpush3.xpose.msk.msra.mxu0 %vm31_vm0, %v1176_v40 }
 0x904   :  { %v762_v35 = vpop.permute.xlu1 %761  ;;  %v1074_v39 = vmul.f32 %v1539_v37, %v1525_v11  ;;  %1486 = vmatprep.subr.msk.mxu0 %vm31_vm0, %v1175_v41  ;;  %p1548_p4 = pnand %p1547_p3, %p1541_p0 }
 0x905   :  { %v768_v17 = vsel %vm767_vm6, %v766_v34, %v762_v35  ;;  %1469 = vmatprep.mubr.msk.f32.mxu1 %vm366_vm2, %v876_v33 }
 0x906   :  { %1470 = vmatmul.mubr.msk.f32.vlgmr.msra.gmra.mxu1 %vm366_vm2, %v878_v36  ;;  %1490 = vmatprep.mubr.msk.f32.mxu0 %vm31_vm0, %v768_v17 }
 0x907   :  { %1478 = vmatpush3.msra.mxu1 %v1076_v16  ;;  %1479 = vmatprep.mubr.msk.f32.mxu1 %vm366_vm2, %v1072_v38 }
 0x908   :  { %1487 = vmatpush3.xpose.msk.msra.mxu0 %vm31_vm0, %v1175_v41 }
 0x909   :  { %1488 = vmatprep.subr.msk.mxu0 %vm31_vm0, %v1174_v43 }
 0x90a   :  { %1480 = vmatmul.mubr.msk.f32.vlgmr.msra.gmra.mxu1 %vm366_vm2, %v1074_v39 }
 0x90c   :  { %1489 = vmatpush3.xpose.msk.msra.mxu0 %vm31_vm0, %v1174_v43 }
 0x9c6   :  { %v1471_v44 = vpop.f32.mrf.mxu1 }
 0x9c7   :  { %1160 = vrot.lane.b32.xlu0 %v1471_v44, %s1568_s1 }
 0x9c8   :  { %v955_v45 = vpop.f32.mrf.mxu1 }
 0x9ca   :  { %v1481_v46 = vpop.f32.mrf.mxu1 }
 0x9cb   :  { %1168 = vrot.lane.b32.xlu1 %v1481_v46, %s1570_s23 }
 0x9cc   :  { %v1150_v47 = vpop.f32.mrf.mxu1 }
 0x9cd   :  { %1164 = vrot.lane.b32.xlu0 %v1150_v47, %s1569_s22 }
 0xa39   :  { %v1161_v48 = vpop.permute.xlu0 %1160 }
 0xa3a   :  { %v1171_v49 = vsel %vm366_vm2, %v955_v45, %v1161_v48 }
 0xa3d   :  { %v1169_v51 = vpop.permute.xlu1 %1168 }
 0xa3f   :  { %v1165_v50 = vpop.permute.xlu0 %1164 }
 0xa40   :  { %v1172_v52 = vsel %vm765_vm5, %v1171_v49, %v1165_v50 }
 0xa41   :  { %v1173_v53 = vsel %vm767_vm6, %v1172_v52, %v1169_v51 }
 0xa42   :  { %1491 = vmatmul.mubr.msk.f32.vlgmr.msra.gmra.mxu0 %vm31_vm0, %v1173_v53 }
 0xb02   :  { %v1492_v54 = vpop.f32.mrf.mxu0 }
 0xb03   :  { %1272 = vst.msk [vmem:[#allocation2 + $0x8] sm:$0xff] %vm31_vm0, %v1492_v54 }
 0xb04   :  { %v1262_v57 = vpop.f32.mrf.mxu0 }
 0xb05   :  { %1271 = vst.msk [vmem:[#allocation2] sm:$0xff] %vm31_vm0, %v1262_v57 }
 0xb06   :  { %1551 = shalt.err (!%p1548_p4)
}
 0xb07   :  { %s1572_s8 = smov 128  }
 0xb08   :  { %1284 = dma.vmem_to_hbm [thread:$0]  %s1279_s6, 256, %s1853_s5, [#allocation3], %s1572_s8, %s1572_s8, %s1568_s1  }
 0xb09   :  { %1560 = dma.done.wait [#allocation3], 256  }
 0xb0a   :  { %1561 = vsyncadd [#allocation3], 4294967040 }
 0xb0b   :  { %1288 = vsyncpa [#allocation3], 1 }

</bundles_post_ra>
